<compile_context>
chip_gen: v6e
topology: v6e:2x2x1
jax: 0.10.0
libtpu: 0.0.40
codegen_flags: <defaults>
</compile_context>

<pallas_src>
import jax
import jax.numpy as jnp
from jax.experimental import pallas as pl
from jax.experimental.pallas import tpu as pltpu


TARGET_BLOCK_ELEMS = 512 * 1024          # ~2 MiB f32 per input block
VMEM_LIMIT_BYTES = 32 * 1024 * 1024
LANE_CANDIDATES = (512, 256, 128)        # lane widths tried (multiples of 128)


def _cdiv(a, b):
    return -(-a // b)


def _round_up(a, b):
    return _cdiv(a, b) * b


def _sublane_multiple(*arrays):
    # Packed-tiling sublane multiple: 8 for 4-byte, 16 for 2-byte, 32 for 1-byte.
    return max(max(8, 32 // jnp.dtype(a.dtype).itemsize) for a in arrays)


def _pick_lanes(n):
    for g in LANE_CANDIDATES:
        if n % g == 0:
            return g
    return None


def _row_tiling(rows, g, sub):
    """Rows per block: full extent if tiny, else a multiple of `sub`, capped at
    ~2 MiB f32 per block. Never exceeds the array's row extent."""
    if rows <= sub:
        return rows
    cap = max(sub, TARGET_BLOCK_ELEMS // g)
    return min(cap, (rows // sub) * sub)


# --------------------------------------------------------------------------
# Kernels
# --------------------------------------------------------------------------

def _make_unweighted_kernel(*, rows, tr, lanes, k_axis, red_rows, mask_needed):
    def kernel(gt_ref, pred_ref, out_ref):
        k = pl.program_id(1)
        gt = gt_ref[...].astype(jnp.float32)       # in-kernel upcast, per tile
        pred = pred_ref[...].astype(jnp.float32)
        # Exact divide (matches the PyTorch reference); an approx reciprocal
        # would perturb the metric at ~1e-4 relative.
        absrel = jnp.abs((gt - pred) / gt)
        if mask_needed:                            # static: ragged row tail only
            lin = pl.program_id(0) * k_axis + k
            valid = rows - lin * tr                # <= 0 for duplicated tail blocks
            row_ids = jax.lax.broadcasted_iota(jnp.int32, (tr, lanes), 0)
            absrel = jnp.where(row_ids < valid, absrel, 0.0)
        if tr == red_rows:
            partial = absrel
        else:
            # Tree-reduce the tile to (8, lanes): pure VPU vreg adds, no XLU.
            partial = absrel.reshape(tr // red_rows, red_rows, lanes).sum(axis=0)

        @pl.when(k == 0)
        def _init():
            out_ref[...] = partial

        @pl.when(k > 0)
        def _accumulate():
            out_ref[...] += partial

    return kernel


def _make_weighted_kernel(*, rows, tr, lanes, k_axis, red_rows, mask_needed):
    def kernel(gt_ref, pred_ref, w_ref, num_ref, den_ref):
        k = pl.program_id(2)
        gt = gt_ref[...].astype(jnp.float32)
        pred = pred_ref[...].astype(jnp.float32)
        w = w_ref[...].astype(jnp.float32)
        num = jnp.abs((gt - pred) / gt) * w
        if mask_needed:
            lin = pl.program_id(1) * k_axis + k
            valid = rows - lin * tr
            keep = jax.lax.broadcasted_iota(jnp.int32, (tr, lanes), 0) < valid
            num = jnp.where(keep, num, 0.0)
            w = jnp.where(keep, w, 0.0)
        if tr == red_rows:
            pn, pd = num, w
        else:
            pn = num.reshape(tr // red_rows, red_rows, lanes).sum(axis=0)
            pd = w.reshape(tr // red_rows, red_rows, lanes).sum(axis=0)

        @pl.when(k == 0)
        def _init():
            num_ref[...] = pn
            den_ref[...] = pd

        @pl.when(k > 0)
        def _accumulate():
            num_ref[...] += pn
            den_ref[...] += pd

    return kernel


# --------------------------------------------------------------------------
# Wrappers
# --------------------------------------------------------------------------

def _abs_rel_unweighted(gt, pred):
    total = int(gt.size)
    flat_gt = gt.reshape(-1)
    flat_pred = pred.reshape(-1)

    g = _pick_lanes(total)
    if g is None:
        # Rare fallback: element count not a multiple of 128. Neutral pad
        # (gt = pred = 1 -> absrel = 0); this is the only path that copies.
        padded = _round_up(total, 128)
        pad = padded - total
        flat_gt = jnp.pad(flat_gt, (0, pad), constant_values=1)
        flat_pred = jnp.pad(flat_pred, (0, pad), constant_values=1)
        g = _pick_lanes(padded)

    n_elems = flat_gt.shape[0]
    rows = n_elems // g
    sub = _sublane_multiple(gt, pred)
    tr = _row_tiling(rows, g, sub)
    nblocks = _cdiv(rows, tr)
    p_axis = 2 if nblocks >= 2 else 1              # keep both v7x TCs busy
    k_axis = _cdiv(nblocks, p_axis)
    mask_needed = p_axis * k_axis * tr > rows
    red_rows = 8 if tr % 8 == 0 else tr

    gt2 = flat_gt.reshape(rows, g)                 # free reshape (contiguous)
    pred2 = flat_pred.reshape(rows, g)

    if p_axis * k_axis > nblocks:                  # odd block count: clamp dup block
        in_idx = lambda p, k: (jnp.minimum(p * k_axis + k, nblocks - 1), 0)
    else:
        in_idx = lambda p, k: (p * k_axis + k, 0)
    in_spec = pl.BlockSpec((tr, g), in_idx)

    kernel = _make_unweighted_kernel(rows=rows, tr=tr, lanes=g, k_axis=k_axis,
                                     red_rows=red_rows, mask_needed=mask_needed)
    partials = pl.pallas_call(
        kernel,
        out_shape=jax.ShapeDtypeStruct((p_axis, red_rows, g), jnp.float32),
        grid=(p_axis, k_axis),
        in_specs=[in_spec, in_spec],
        out_specs=pl.BlockSpec((None, red_rows, g), lambda p, k: (p, 0, 0)),
        compiler_params=pltpu.CompilerParams(
            dimension_semantics=("parallel", "arbitrary"),
            vmem_limit_bytes=VMEM_LIMIT_BYTES,
        ),
    )(gt2, pred2)

    # mean-of-means == global mean: every batch sample has the same element count.
    return jnp.sum(partials) / jnp.float32(total)


def _abs_rel_weighted(gt, pred, weights):
    b = gt.shape[0]
    n = int(gt.size) // b
    gt2 = gt.reshape(b, -1)
    pred2 = pred.reshape(b, -1)
    w2 = weights.reshape(b, -1)

    g = _pick_lanes(n)
    if g is None:
        # Rare fallback: per-sample size not a multiple of 128. Neutral pad
        # (gt = pred = 1, w = 0 -> contributes 0 to both sums).
        padded = _round_up(n, 128)
        pad = padded - n
        gt2 = jnp.pad(gt2, ((0, 0), (0, pad)), constant_values=1)
        pred2 = jnp.pad(pred2, ((0, 0), (0, pad)), constant_values=1)
        w2 = jnp.pad(w2, ((0, 0), (0, pad)), constant_values=0)
        g = _pick_lanes(padded)

    rows = gt2.shape[1] // g
    sub = _sublane_multiple(gt, pred, weights)
    tr = _row_tiling(rows, g, sub)
    nblocks = _cdiv(rows, tr)
    # Batch is the natural parallel axis; add a row split only when the batch
    # alone cannot keep both v7x TensorCores busy.
    p_axis = 2 if (b % 2 == 1 and nblocks >= 2) else 1
    k_axis = _cdiv(nblocks, p_axis)
    mask_needed = p_axis * k_axis * tr > rows
    red_rows = 8 if tr % 8 == 0 else tr

    gt3 = gt2.reshape(b, rows, g)                  # free reshape (contiguous)
    pred3 = pred2.reshape(b, rows, g)
    w3 = w2.reshape(b, rows, g)

    if p_axis * k_axis > nblocks:
        in_idx = lambda i, p, k: (i, jnp.minimum(p * k_axis + k, nblocks - 1), 0)
    else:
        in_idx = lambda i, p, k: (i, p * k_axis + k, 0)
    in_spec = pl.BlockSpec((None, tr, g), in_idx)
    out_spec = pl.BlockSpec((None, None, red_rows, g), lambda i, p, k: (i, p, 0, 0))
    out_sds = jax.ShapeDtypeStruct((b, p_axis, red_rows, g), jnp.float32)

    kernel = _make_weighted_kernel(rows=rows, tr=tr, lanes=g, k_axis=k_axis,
                                   red_rows=red_rows, mask_needed=mask_needed)
    num, den = pl.pallas_call(
        kernel,
        out_shape=(out_sds, out_sds),
        grid=(b, p_axis, k_axis),
        in_specs=[in_spec, in_spec, in_spec],
        out_specs=(out_spec, out_spec),
        compiler_params=pltpu.CompilerParams(
            dimension_semantics=("parallel", "parallel", "arbitrary"),
            vmem_limit_bytes=VMEM_LIMIT_BYTES,
        ),
    )(gt3, pred3, w3)

    num_b = jnp.sum(num, axis=(1, 2, 3))           # tiny cleanup reductions in XLA
    den_b = jnp.sum(den, axis=(1, 2, 3))
    return jnp.mean(num_b / den_b)


def abs_rel(gt, pred, weights=None, mask=None):
    if mask is not None:
        # TODO(synk): boolean-mask indexing yields a data-dependent shape; no clean Pallas equivalent.
        raise NotImplementedError("mask path not supported")
    if weights is None:
        return _abs_rel_unweighted(gt, pred)
    return _abs_rel_weighted(gt, pred, weights)


# --------------------------------------------------------------------------
# Plain-JAX reference mirroring the PyTorch module
# --------------------------------------------------------------------------

def _abs_rel_ref(gt, pred, weights=None):
    dims = tuple(range(1, gt.ndim))
    absrel = jnp.abs((gt - pred) / gt)
    if weights is None:
        return jnp.mean(jnp.mean(absrel, axis=dims))
    absrel = absrel * weights
    return jnp.mean(jnp.sum(absrel, axis=dims) / jnp.sum(weights, axis=dims))


if __name__ == "__main__":
    key = jax.random.PRNGKey(0)
    k1, k2, k3 = jax.random.split(key, 3)

    def run_case(shape):
        # gt kept away from zero (it is a denominator), as a depth map would be.
        gt = jax.random.uniform(k1, shape, jnp.float32, minval=0.5, maxval=2.0)
        pred = jax.random.uniform(k2, shape, jnp.float32, minval=0.5, maxval=2.0)
        weights = jax.random.uniform(k3, shape, jnp.float32, minval=0.1, maxval=1.0)

        out_plain = jax.block_until_ready(abs_rel(gt, pred))
        out_weighted = jax.block_until_ready(abs_rel(gt, pred, weights))

        ref_plain = _abs_rel_ref(gt, pred)
        ref_weighted = _abs_rel_ref(gt, pred, weights)

        assert jnp.allclose(out_plain, ref_plain, rtol=5e-5, atol=1e-6), \
            (shape, out_plain, ref_plain)
        assert jnp.allclose(out_weighted, ref_weighted, rtol=5e-5, atol=1e-6), \
            (shape, out_weighted, ref_weighted)

    # Small tile-aligned case (single block per sample).
    run_case((2, 4, 16, 16))
    # Ragged case: exercises multi-block streaming, the "arbitrary" reduction
    # axis, the parallel block split and in-kernel row masking (no pad copy).
    run_case((2, 4, 129, 256))

    print("KERNEL_OK")
</pallas_src>

<mosaic_0001>
module attributes {stable_mosaic.version = 11 : i64} {
  func.func @kernel(%arg0: i32, %arg1: i32, %arg2: memref<4x512xf32, #tpu.memory_space<vmem>>, %arg3: memref<4x512xf32, #tpu.memory_space<vmem>>, %arg4: memref<1x4x512xf32, #tpu.memory_space<vmem>>) attributes {dimension_semantics = [#tpu.dimension_semantics<parallel>, #tpu.dimension_semantics<arbitrary>], iteration_bounds = array<i64: 1, 1>, scalar_prefetch = 0 : i64, scratch_operands = 0 : i64, tpu.core_type = #tpu.core_type<tc>, window_params = [{transform_indices = @transform_0, window_bounds = array<i64: 4, 512>}, {transform_indices = @transform_1, window_bounds = array<i64: 4, 512>}, {transform_indices = @transform_2, window_bounds = array<i64: 1, 4, 512>}]} {
    %c0 = arith.constant 0 : index
    %c0_0 = arith.constant 0 : index
    %0 = vector.load %arg2[%c0, %c0_0] : memref<4x512xf32, #tpu.memory_space<vmem>>, vector<4x512xf32>
    %c0_1 = arith.constant 0 : index
    %c0_2 = arith.constant 0 : index
    %1 = vector.load %arg3[%c0_1, %c0_2] : memref<4x512xf32, #tpu.memory_space<vmem>>, vector<4x512xf32>
    %2 = arith.subf %0, %1 : vector<4x512xf32>
    %3 = arith.divf %2, %0 : vector<4x512xf32>
    %4 = math.absf %3 : vector<4x512xf32>
    %c0_i32 = arith.constant 0 : i32
    %5 = arith.cmpi eq, %arg1, %c0_i32 : i32
    %6 = arith.extui %5 : i1 to i32
    %c0_i32_3 = arith.constant 0 : i32
    %7 = arith.cmpi ne, %6, %c0_i32_3 : i32
    scf.if %7 {
      %c0_6 = arith.constant 0 : index
      %c0_7 = arith.constant 0 : index
      %c0_8 = arith.constant 0 : index
      %11 = vector.load %arg4[%c0_6, %c0_7, %c0_8] : memref<1x4x512xf32, #tpu.memory_space<vmem>>, vector<1x4x512xf32>
      %12 = vector.shape_cast %11 : vector<1x4x512xf32> to vector<4x512xf32>
      %13 = vector.shape_cast %4 : vector<4x512xf32> to vector<1x4x512xf32>
      tpu.vector_store %arg4[%c0_6, %c0_7, %c0_8], %13 {strides = array<i32>} : memref<1x4x512xf32, #tpu.memory_space<vmem>>, vector<1x4x512xf32>,
    } else {
    }
    %c0_i32_4 = arith.constant 0 : i32
    %8 = arith.cmpi sgt, %arg1, %c0_i32_4 : i32
    %9 = arith.extui %8 : i1 to i32
    %c0_i32_5 = arith.constant 0 : i32
    %10 = arith.cmpi ne, %9, %c0_i32_5 : i32
    scf.if %10 {
      %c0_6 = arith.constant 0 : index
      %c0_7 = arith.constant 0 : index
      %c0_8 = arith.constant 0 : index
      %11 = vector.load %arg4[%c0_6, %c0_7, %c0_8] : memref<1x4x512xf32, #tpu.memory_space<vmem>>, vector<1x4x512xf32>
      %12 = vector.shape_cast %11 : vector<1x4x512xf32> to vector<4x512xf32>
      %13 = arith.addf %12, %4 : vector<4x512xf32>
      %c0_9 = arith.constant 0 : index
      %c0_10 = arith.constant 0 : index
      %c0_11 = arith.constant 0 : index
      %14 = vector.load %arg4[%c0_9, %c0_10, %c0_11] : memref<1x4x512xf32, #tpu.memory_space<vmem>>, vector<1x4x512xf32>
      %15 = vector.shape_cast %14 : vector<1x4x512xf32> to vector<4x512xf32>
      %16 = vector.shape_cast %13 : vector<4x512xf32> to vector<1x4x512xf32>
      tpu.vector_store %arg4[%c0_9, %c0_10, %c0_11], %16 {strides = array<i32>} : memref<1x4x512xf32, #tpu.memory_space<vmem>>, vector<1x4x512xf32>,
    } else {
    }
    return
  }
  func.func @transform_0(%arg0: i32, %arg1: i32) -> (i32, i32) {
    %c1_i32 = arith.constant 1 : i32
    %0 = arith.muli %arg0, %c1_i32 : i32
    %1 = arith.addi %0, %arg1 : i32
    %c0_i32 = arith.constant 0 : i32
    %c0_i32_0 = arith.constant 0 : i32
    return %1, %c0_i32 : i32, i32
  }
  func.func @transform_1(%arg0: i32, %arg1: i32) -> (i32, i32) {
    %c1_i32 = arith.constant 1 : i32
    %0 = arith.muli %arg0, %c1_i32 : i32
    %1 = arith.addi %0, %arg1 : i32
    %c0_i32 = arith.constant 0 : i32
    %c0_i32_0 = arith.constant 0 : i32
    return %1, %c0_i32 : i32, i32
  }
  func.func @transform_2(%arg0: i32, %arg1: i32) -> (i32, i32, i32) {
    %c0_i32 = arith.constant 0 : i32
    %c0_i32_0 = arith.constant 0 : i32
    %c0_i32_1 = arith.constant 0 : i32
    return %arg0, %c0_i32, %c0_i32_0 : i32, i32, i32
  }
}

</mosaic_0001>

<bundles_post_ra>
// kernel: tpu_custom_call.1
= control target key start
LH: loop header
LB: loop body
LE: loop exit
PB: predicated region body
PF: predicated region fallthrough
CT: control target
= control target key end

     0   :  { %7 = vsyncpa [#allocation3], 0  ;;  %s190_s0 = inlined_call_operand.hbm [shape: f32[4,512], index: 0, kind: input, shape index: {}]   ;;  %s191_s1 = inlined_call_operand.hbm [shape: f32[4,512], index: 1, kind: input, shape index: {}]   ;;  %s192_s2 = inlined_call_operand.hbm [shape: f32[1,4,512], index: 2, kind: output, shape index: {}]  }
   0x1   :  { %8 = vsyncpa [#allocation6], 0 }
   0x2   :  { %9 = vsyncpa [#allocation4], 0  ;;  %s163_s9 = smov [#allocation2]   ;;  %s164_s11 = smov [#allocation5]  }
   0x3   :  { %s20_s10 = sshll.u32 %s163_s9, 4  ;;  %s34_s12 = sshll.u32 %s164_s11, 4  ;;  %s21_s10 = int_to_ptr.vmem [resolvable:$true] %s20_s10  ;;  %s35_s12 = int_to_ptr.vmem [resolvable:$true] %s34_s12 }
   0x4   :  { %s105_s13 = scalar_lea.vmem %s21_s10, 256  ;;  %p110_p1 = scmp.lt.s32.totalorder %s21_s10, %s21_s10 }
   0x5   :  { %p106_p0 = scmp.ne.s32.totalorder %s21_s10, %s105_s13  ;;  %p111_p2 = scmp.lt.s32.totalorder %s105_s13, %s105_s13 }
   0x7   :  { %p112_p3 = por %p111_p2, %p110_p1 }
   0x9   :  { %p113_p4 = pnand %p112_p3, %p106_p0 }
   0xb   :  { %116 = shalt.err (!%p113_p4)
}
   0xc   :  { %23 = dma.hbm_to_vmem [thread:$0]  %s190_s0, 256, %s21_s10, [#allocation3]  }
   0xd   :  { %s125_s16 = scalar_lea.vmem %s35_s12, 256  ;;  %p130_p6 = scmp.lt.s32.totalorder %s35_s12, %s35_s12 }
   0xe   :  { %p126_p5 = scmp.ne.s32.totalorder %s35_s12, %s125_s16  ;;  %p131_p7 = scmp.lt.s32.totalorder %s125_s16, %s125_s16 }
  0x10   :  { %p132_p8 = por %p131_p7, %p130_p6 }
  0x12   :  { %p133_p9 = pnand %p132_p8, %p126_p5 }
  0x14   :  { %136 = shalt.err (!%p133_p9)
}
  0x15   :  { %37 = dma.hbm_to_vmem [thread:$0]  %s191_s1, 256, %s35_s12, [#allocation6]  }
  0x16   :  { %157 = dma.done.wait [#allocation3], 256  }
  0x17   :  { %158 = vsyncadd [#allocation3], 4294967040 }
  0x18   :  { %159 = dma.done.wait [#allocation6], 256  }
  0x19   :  { %160 = vsyncadd [#allocation6], 4294967040  ;;  %v46_v0 = vld [vmem:[#allocation2] sm:$0xff]  ;;  %v47_v1 = vld [vmem:[#allocation2 + $0x8] sm:$0xff]  ;;  %s165_s0 = smov [#allocation7]  }
  0x1a   :  { %93 = vrcp.f32 %v46_v0  ;;  %v48_v2 = vld [vmem:[#allocation5] sm:$0xff]  ;;  %v49_v3 = vld [vmem:[#allocation5 + $0x8] sm:$0xff]  ;;  %s80_s19 = sshll.u32 %s165_s0, 4  ;;  %s81_s19 = int_to_ptr.vmem [resolvable:$true] %s80_s19 }
  0x1b   :  { %95 = vrcp.f32 %v47_v1  ;;  %v50_v4 = vsub.f32 %v46_v0, %v48_v2  ;;  %v51_v5 = vsub.f32 %v47_v1, %v49_v3  ;;  %s137_s1 = scalar_lea.vmem %s81_s19, 256  ;;  %p142_p11 = scmp.lt.s32.totalorder %s81_s19, %s81_s19 }
  0x1c   :  { %p138_p10 = scmp.ne.s32.totalorder %s81_s19, %s137_s1  ;;  %p143_p12 = scmp.lt.s32.totalorder %s137_s1, %s137_s1 }
  0x1e   :  { %p144_p13 = por %p143_p12, %p142_p11 }
  0x20   :  { %p145_p0 = pnand %p144_p13, %p138_p10 }
  0x27   :  { %v94_v6 = vpop.eup %93 }
  0x28   :  { %v96_v7 = vpop.eup %95  ;;  %v53_v8 = vmul.f32 %v94_v6, %v50_v4 }
  0x29   :  { %v55_v9 = vmul.f32 %v96_v7, %v51_v5 }
  0x2a   :  { %v56_v10 = vand.u32 2147483647, %v53_v8 }
  0x2b   :  { %v57_v11 = vand.u32 2147483647, %v55_v9 }
  0x2c   :  { %62 = vst [vmem:[#allocation7] sm:$0xff] %v56_v10 }
  0x2d   :  { %63 = vst [vmem:[#allocation7 + $0x8] sm:$0xff] %v57_v11 }
  0x2e   :  { %148 = shalt.err (!%p145_p0)
}
  0x2f   :  { %83 = dma.vmem_to_hbm [thread:$0]  %s81_s19, 256, %s192_s2, [#allocation4]  }
  0x30   :  { %161 = dma.done.wait [#allocation4], 256  }
  0x31   :  { %162 = vsyncadd [#allocation4], 4294967040 }
  0x32   :  { %87 = vsyncpa [#allocation3], 1 }
  0x33   :  { %88 = vsyncpa [#allocation6], 1 }
  0x34   :  { %89 = vsyncpa [#allocation4], 1 }

</bundles_post_ra>
